<compile_context>
chip_gen: v5e
topology: v5e:2x2
jax: 0.10.0
libtpu: 0.0.40
codegen_flags: <defaults>
</compile_context>

<pallas_src>
import functools

import jax
import jax.numpy as jnp
from jax import lax
from jax.experimental import pallas as pl
from jax.experimental.pallas import tpu as pltpu


# ----------------------------------------------------------------------------
# Fused MHA kernel: grid = (batch, q_tile).  One step = one (tq, D) output tile.
# ----------------------------------------------------------------------------
def _fused_mha_kernel(x_ref, wq_ref, bq_ref, wkv_ref, bkv_ref, wout_ref, bout_ref,
                      o_ref, kv_scratch, *, n_heads):
    S, D = x_ref.shape            # full sequence slab for this batch element
    tq = o_ref.shape[0]           # query tile size
    hd = D // n_heads
    i = pl.program_id(1)          # q-tile index ("arbitrary" axis)

    # --- K/V projection: once per batch element, reused by all q-tiles. ---------
    @pl.when(i == 0)
    def _():
        x_bf = x_ref[...].astype(jnp.bfloat16)                               # (S, D)
        kv = jnp.dot(x_bf, wkv_ref[...],
                     preferred_element_type=jnp.float32) + bkv_ref[...]      # (S, 2D) f32
        kv_scratch[...] = kv.astype(jnp.bfloat16)                            # (S, 2D) bf16

    # --- Q projection for this query tile (1/sqrt(hd) folded into wq/bq). -------
    q_start = pl.multiple_of(i * tq, tq)
    xq = x_ref[pl.ds(q_start, tq), :].astype(jnp.bfloat16)                   # (tq, D)
    q = jnp.dot(xq, wq_ref[...],
                preferred_element_type=jnp.float32) + bq_ref[...]            # (tq, D) f32
    q_bf = q.astype(jnp.bfloat16)

    kv = kv_scratch[...]                                                     # (S, 2D) bf16

    # --- Per-head SDP attention; contexts concatenated, ONE out_proj matmul. ----
    ctx_parts = []
    for h in range(n_heads):
        sl = slice(h * hd, (h + 1) * hd)
        qh = q_bf[:, sl]                                                     # (tq, hd) bf16
        kh = kv[:, sl]                                                       # (S, hd)  bf16
        vh = kv[:, D + h * hd: D + (h + 1) * hd]                             # (S, hd)  bf16

        # Q @ K^T without materializing a transpose of K (contract dim 1 vs dim 1).
        s = lax.dot_general(qh, kh, (((1,), (1,)), ((), ())),
                            preferred_element_type=jnp.float32)              # (tq, S) f32

        # Softmax strictly in f32 (VPU/EUP); approx reciprocal uses the EUP slot.
        m = jnp.max(s, axis=-1, keepdims=True)
        p = jnp.exp(s - m)
        denom = jnp.sum(p, axis=-1, keepdims=True)
        attn = (p * pl.reciprocal(denom, approx=True)).astype(jnp.bfloat16)  # (tq, S)

        ctx_parts.append(jnp.dot(attn, vh,
                                 preferred_element_type=jnp.float32))        # (tq, hd) f32

    ctx = jnp.concatenate(ctx_parts, axis=-1).astype(jnp.bfloat16)           # (tq, D) bf16

    out = jnp.dot(ctx, wout_ref[...],
                  preferred_element_type=jnp.float32) + bout_ref[...]        # (tq, D) f32
    o_ref[...] = out.astype(o_ref.dtype)


# ----------------------------------------------------------------------------
# One-time weight prep (outside jit): transpose, de-interleave heads, fold scale,
# split into Q / KV blocks, cast matmul weights to bf16 (biases stay f32).
# ----------------------------------------------------------------------------
def prepare_params(params, n_heads):
    w_qkv, b_qkv = params["w_qkv"], params["b_qkv"]                  # (3D, D), (3D,)
    w_out, b_out = params["w_out"], params["b_out"]                  # (D, D), (D,)
    three_d, D = w_qkv.shape
    hd = D // n_heads

    # PyTorch packs qkv_proj outputs head-interleaved: col = h*3*hd + part*hd + e.
    # Permute columns to contiguous [Q (all heads) | K (all heads) | V (all heads)].
    idx = jnp.arange(three_d).reshape(n_heads, 3, hd)
    perm = jnp.transpose(idx, (1, 0, 2)).reshape(three_d)

    w_qkv_t = jnp.transpose(w_qkv)[:, perm]                          # (D, 3D), (in, out)
    b_qkv_p = b_qkv[perm]

    # Fold the attention scale 1/sqrt(head_dim) into the Q block.
    scale = 1.0 / (hd ** 0.5)
    w_q = (w_qkv_t[:, :D] * scale).astype(jnp.bfloat16)              # (D, D)
    b_q = (b_qkv_p[:D] * scale).astype(jnp.float32)
    w_kv = w_qkv_t[:, D:].astype(jnp.bfloat16)                       # (D, 2D)
    b_kv = b_qkv_p[D:].astype(jnp.float32)

    return {
        "w_q": w_q,                                                  # (D, D)  bf16
        "b_q": b_q.reshape(1, D),                                    # (1, D)  f32
        "w_kv": w_kv,                                                # (D, 2D) bf16
        "b_kv": b_kv.reshape(1, 2 * D),                              # (1, 2D) f32
        "w_out_t": jnp.transpose(w_out).astype(jnp.bfloat16),        # (D, D)  bf16
        "b_out": b_out.astype(jnp.float32).reshape(1, D),            # (1, D)  f32
    }


def _pick_q_tile(S):
    for t in (256, 128, 64, 32, 16, 8):
        if t <= S and S % t == 0:
            return t
    return S


def _vmem_limit_bytes(S, D, tq):
    bf16, f32 = 2, 4
    weights = (D * D + D * 2 * D + D * D) * bf16 + (D + 2 * D + D) * f32
    x_blk = 2 * S * D * f32            # double-buffered per-batch input slab
    o_blk = 2 * tq * D * f32           # double-buffered output tile
    kv_scr = S * 2 * D * bf16          # persistent KV scratch
    work = 4 * tq * S * f32 + 2 * tq * 3 * D * f32 + 4 * tq * D * f32
    est = 2 * weights + x_blk + o_blk + kv_scr + work
    return int(min(max(4 * est, 8 * 2 ** 20), 64 * 2 ** 20))


# ----------------------------------------------------------------------------
# Forward: a single fused pallas_call, grid = (B, S // tq).
# ----------------------------------------------------------------------------
def multi_head_attention_forward(x, prepped, n_heads):
    B, S, D = x.shape
    tq = _pick_q_tile(S)
    kernel = functools.partial(_fused_mha_kernel, n_heads=n_heads)
    return pl.pallas_call(
        kernel,
        out_shape=jax.ShapeDtypeStruct((B, S, D), x.dtype),
        grid_spec=pltpu.PrefetchScalarGridSpec(
            num_scalar_prefetch=0,
            grid=(B, S // tq),
            in_specs=[
                # Full-sequence slab per batch (constant over q-tiles -> no re-DMA).
                pl.BlockSpec((None, S, D), lambda b, i: (b, 0, 0)),
                pl.BlockSpec((D, D), lambda b, i: (0, 0)),           # w_q   (resident)
                pl.BlockSpec((1, D), lambda b, i: (0, 0)),           # b_q
                pl.BlockSpec((D, 2 * D), lambda b, i: (0, 0)),       # w_kv  (resident)
                pl.BlockSpec((1, 2 * D), lambda b, i: (0, 0)),       # b_kv
                pl.BlockSpec((D, D), lambda b, i: (0, 0)),           # w_out (resident)
                pl.BlockSpec((1, D), lambda b, i: (0, 0)),           # b_out
            ],
            out_specs=pl.BlockSpec((None, tq, D), lambda b, i: (b, i, 0)),
            scratch_shapes=[pltpu.VMEM((S, 2 * D), jnp.bfloat16)],   # per-batch K|V
        ),
        compiler_params=pltpu.CompilerParams(
            dimension_semantics=("parallel", "arbitrary"),
            vmem_limit_bytes=_vmem_limit_bytes(S, D, tq)),
    )(x, prepped["w_q"], prepped["b_q"], prepped["w_kv"], prepped["b_kv"],
      prepped["w_out_t"], prepped["b_out"])


# ----------------------------------------------------------------------------
# Pure-JAX reference (PyTorch semantics, original un-prepped f32 params).
# ----------------------------------------------------------------------------
def reference_forward(x, params, n_heads):
    B, S, D = x.shape
    hd = D // n_heads
    qkv = x @ params["w_qkv"].T + params["b_qkv"]
    qkv = qkv.reshape(B, S, n_heads, 3 * hd)
    q, k, v = jnp.split(qkv, 3, axis=-1)
    q, k, v = [jnp.transpose(t, (0, 2, 1, 3)) for t in (q, k, v)]
    s = jnp.einsum("bhqd,bhkd->bhqk", q, k) / jnp.sqrt(jnp.float32(hd))
    p = jax.nn.softmax(s, axis=-1)
    o = jnp.einsum("bhqk,bhkd->bhqd", p, v)
    o = jnp.transpose(o, (0, 2, 1, 3)).reshape(B, S, D)
    return o @ params["w_out"].T + params["b_out"]


def init_params(key, d_model):
    # PyTorch nn.Linear default init: U(-1/sqrt(fan_in), 1/sqrt(fan_in))
    k1, k2, k3, k4 = jax.random.split(key, 4)
    bound = 1.0 / jnp.sqrt(jnp.float32(d_model))
    return {
        "w_qkv": jax.random.uniform(k1, (3 * d_model, d_model), jnp.float32, -bound, bound),
        "b_qkv": jax.random.uniform(k2, (3 * d_model,), jnp.float32, -bound, bound),
        "w_out": jax.random.uniform(k3, (d_model, d_model), jnp.float32, -bound, bound),
        "b_out": jax.random.uniform(k4, (d_model,), jnp.float32, -bound, bound),
    }


if __name__ == "__main__":
    B, S, D, H = 2, 8, 32, 4   # batch, seq, d_model, n_heads (head_dim = 8)

    key = jax.random.PRNGKey(0)
    kx, kp = jax.random.split(key)
    x = jax.random.normal(kx, (B, S, D), dtype=jnp.float32)
    params = init_params(kp, D)

    prepped = prepare_params(params, H)   # one-time, outside jit

    fwd = jax.jit(functools.partial(multi_head_attention_forward, n_heads=H))
    out = jax.block_until_ready(fwd(x, prepped))

    ref = reference_forward(x, params, H)
    assert out.shape == (B, S, D)
    # Tolerance accounts for bf16 matmul operands (f32 accumulation) + approx reciprocal.
    assert jnp.allclose(out, ref, atol=5e-2, rtol=5e-2), "mismatch vs reference"

    print("KERNEL_OK")
</pallas_src>

<mosaic_0001>
module attributes {stable_mosaic.version = 11 : i64} {
  func.func @_fused_mha_kernel(%arg0: i32, %arg1: i32, %arg2: memref<1x8x32xf32, #tpu.memory_space<vmem>>, %arg3: memref<32x32xbf16, #tpu.memory_space<vmem>>, %arg4: memref<1x32xf32, #tpu.memory_space<vmem>>, %arg5: memref<32x64xbf16, #tpu.memory_space<vmem>>, %arg6: memref<1x64xf32, #tpu.memory_space<vmem>>, %arg7: memref<32x32xbf16, #tpu.memory_space<vmem>>, %arg8: memref<1x32xf32, #tpu.memory_space<vmem>>, %arg9: memref<1x8x32xf32, #tpu.memory_space<vmem>>, %arg10: memref<8x64xbf16, #tpu.memory_space<vmem>>) attributes {dimension_semantics = [#tpu.dimension_semantics<parallel>, #tpu.dimension_semantics<arbitrary>], iteration_bounds = array<i64: 2, 1>, scalar_prefetch = 0 : i64, scratch_operands = 1 : i64, tpu.core_type = #tpu.core_type<tc>, window_params = [{transform_indices = @transform_0, window_bounds = array<i64: 1, 8, 32>}, {pipeline_mode = #tpu.pipeline_mode<synchronous>, transform_indices = @transform_1, window_bounds = array<i64: 32, 32>}, {pipeline_mode = #tpu.pipeline_mode<synchronous>, transform_indices = @transform_2, window_bounds = array<i64: 1, 32>}, {pipeline_mode = #tpu.pipeline_mode<synchronous>, transform_indices = @transform_3, window_bounds = array<i64: 32, 64>}, {pipeline_mode = #tpu.pipeline_mode<synchronous>, transform_indices = @transform_4, window_bounds = array<i64: 1, 64>}, {pipeline_mode = #tpu.pipeline_mode<synchronous>, transform_indices = @transform_5, window_bounds = array<i64: 32, 32>}, {pipeline_mode = #tpu.pipeline_mode<synchronous>, transform_indices = @transform_6, window_bounds = array<i64: 1, 32>}, {transform_indices = @transform_7, window_bounds = array<i64: 1, 8, 32>}]} {
    %c0_i32 = arith.constant 0 : i32
    %0 = arith.cmpi eq, %arg1, %c0_i32 : i32
    %1 = arith.extui %0 : i1 to i32
    %c0_i32_0 = arith.constant 0 : i32
    %2 = arith.cmpi ne, %1, %c0_i32_0 : i32
    scf.if %2 {
      %c0_32 = arith.constant 0 : index
      %c0_33 = arith.constant 0 : index
      %c0_34 = arith.constant 0 : index
      %90 = vector.load %arg2[%c0_32, %c0_33, %c0_34] : memref<1x8x32xf32, #tpu.memory_space<vmem>>, vector<1x8x32xf32>
      %91 = vector.shape_cast %90 : vector<1x8x32xf32> to vector<8x32xf32>
      %92 = arith.truncf %91 : vector<8x32xf32> to vector<8x32xbf16>
      %c0_35 = arith.constant 0 : index
      %c0_36 = arith.constant 0 : index
      %93 = vector.load %arg5[%c0_35, %c0_36] : memref<32x64xbf16, #tpu.memory_space<vmem>>, vector<32x64xbf16>
      %cst_37 = arith.constant dense<0.000000e+00> : vector<8x64xf32>
      %94 = tpu.matmul %92, %93, %cst_37 {dimension_numbers = #tpu.dot_dimension_numbers<[1], [0], [0], [1], [0, 0, 1, 1], [], []>} : vector<8x32xbf16>, vector<32x64xbf16>, vector<8x64xf32> -> vector<8x64xf32>
      %c0_38 = arith.constant 0 : index
      %c0_39 = arith.constant 0 : index
      %95 = vector.load %arg6[%c0_38, %c0_39] : memref<1x64xf32, #tpu.memory_space<vmem>>, vector<1x64xf32>
      %96 = vector.broadcast %95 : vector<1x64xf32> to vector<8x64xf32>
      %97 = arith.addf %94, %96 : vector<8x64xf32>
      %98 = arith.truncf %97 : vector<8x64xf32> to vector<8x64xbf16>
      %c0_40 = arith.constant 0 : index
      %c0_41 = arith.constant 0 : index
      %99 = vector.load %arg10[%c0_40, %c0_41] : memref<8x64xbf16, #tpu.memory_space<vmem>>, vector<8x64xbf16>
      tpu.vector_store %arg10[%c0_40, %c0_41], %98 {strides = array<i32>} : memref<8x64xbf16, #tpu.memory_space<vmem>>, vector<8x64xbf16>,
    } else {
    }
    %c8_i32 = arith.constant 8 : i32
    %3 = arith.muli %arg1, %c8_i32 : i32
    %4 = tpu.assume_multiple %3, 8 : i32
    %c0 = arith.constant 0 : index
    %5 = arith.index_cast %4 : i32 to index
    %c0_1 = arith.constant 0 : index
    %6 = vector.load %arg2[%c0, %5, %c0_1] : memref<1x8x32xf32, #tpu.memory_space<vmem>>, vector<1x8x32xf32>
    %7 = vector.shape_cast %6 : vector<1x8x32xf32> to vector<8x32xf32>
    %8 = arith.truncf %7 : vector<8x32xf32> to vector<8x32xbf16>
    %c0_2 = arith.constant 0 : index
    %c0_3 = arith.constant 0 : index
    %9 = vector.load %arg3[%c0_2, %c0_3] : memref<32x32xbf16, #tpu.memory_space<vmem>>, vector<32x32xbf16>
    %cst = arith.constant dense<0.000000e+00> : vector<8x32xf32>
    %10 = tpu.matmul %8, %9, %cst {dimension_numbers = #tpu.dot_dimension_numbers<[1], [0], [0], [1], [0, 0, 1, 1], [], []>} : vector<8x32xbf16>, vector<32x32xbf16>, vector<8x32xf32> -> vector<8x32xf32>
    %c0_4 = arith.constant 0 : index
    %c0_5 = arith.constant 0 : index
    %11 = vector.load %arg4[%c0_4, %c0_5] : memref<1x32xf32, #tpu.memory_space<vmem>>, vector<1x32xf32>
    %12 = vector.broadcast %11 : vector<1x32xf32> to vector<8x32xf32>
    %13 = arith.addf %10, %12 : vector<8x32xf32>
    %14 = arith.truncf %13 : vector<8x32xf32> to vector<8x32xbf16>
    %c0_6 = arith.constant 0 : index
    %c0_7 = arith.constant 0 : index
    %15 = vector.load %arg10[%c0_6, %c0_7] : memref<8x64xbf16, #tpu.memory_space<vmem>>, vector<8x64xbf16>
    %16 = vector.extract_strided_slice %14 {offsets = [0, 0], sizes = [8, 8], strides = [1, 1]} : vector<8x32xbf16> to vector<8x8xbf16>
    %17 = vector.extract_strided_slice %15 {offsets = [0, 0], sizes = [8, 8], strides = [1, 1]} : vector<8x64xbf16> to vector<8x8xbf16>
    %18 = vector.extract_strided_slice %15 {offsets = [0, 32], sizes = [8, 8], strides = [1, 1]} : vector<8x64xbf16> to vector<8x8xbf16>
    %cst_8 = arith.constant dense<0.000000e+00> : vector<8x8xf32>
    %19 = tpu.matmul %16, %17, %cst_8 {dimension_numbers = #tpu.dot_dimension_numbers<[1], [1], [0], [0], [0, 0, 1, 0], [], []>} : vector<8x8xbf16>, vector<8x8xbf16>, vector<8x8xf32> -> vector<8x8xf32>
    %cst_9 = arith.constant dense<0xFF800000> : vector<8xf32>
    %20 = vector.multi_reduction <maximumf>, %19, %cst_9 [1] : vector<8x8xf32> to vector<8xf32>
    %21 = vector.shape_cast %20 : vector<8xf32> to vector<8x1xf32>
    %22 = vector.broadcast %21 : vector<8x1xf32> to vector<8x8xf32>
    %23 = arith.subf %19, %22 : vector<8x8xf32>
    %24 = math.exp %23 : vector<8x8xf32>
    %cst_10 = arith.constant dense<0.000000e+00> : vector<8xf32>
    %25 = vector.multi_reduction <add>, %24, %cst_10 [1] : vector<8x8xf32> to vector<8xf32>
    %26 = vector.shape_cast %25 : vector<8xf32> to vector<8x1xf32>
    %27 = tpu.reciprocal %26 {approx = true} : vector<8x1xf32> -> vector<8x1xf32>
    %28 = vector.broadcast %27 : vector<8x1xf32> to vector<8x8xf32>
    %29 = arith.mulf %24, %28 : vector<8x8xf32>
    %30 = arith.truncf %29 : vector<8x8xf32> to vector<8x8xbf16>
    %cst_11 = arith.constant dense<0.000000e+00> : vector<8x8xf32>
    %31 = tpu.matmul %30, %18, %cst_11 {dimension_numbers = #tpu.dot_dimension_numbers<[1], [0], [0], [1], [0, 0, 1, 1], [], []>} : vector<8x8xbf16>, vector<8x8xbf16>, vector<8x8xf32> -> vector<8x8xf32>
    %32 = vector.extract_strided_slice %14 {offsets = [0, 8], sizes = [8, 8], strides = [1, 1]} : vector<8x32xbf16> to vector<8x8xbf16>
    %33 = vector.extract_strided_slice %15 {offsets = [0, 8], sizes = [8, 8], strides = [1, 1]} : vector<8x64xbf16> to vector<8x8xbf16>
    %34 = vector.extract_strided_slice %15 {offsets = [0, 40], sizes = [8, 8], strides = [1, 1]} : vector<8x64xbf16> to vector<8x8xbf16>
    %cst_12 = arith.constant dense<0.000000e+00> : vector<8x8xf32>
    %35 = tpu.matmul %32, %33, %cst_12 {dimension_numbers = #tpu.dot_dimension_numbers<[1], [1], [0], [0], [0, 0, 1, 0], [], []>} : vector<8x8xbf16>, vector<8x8xbf16>, vector<8x8xf32> -> vector<8x8xf32>
    %cst_13 = arith.constant dense<0xFF800000> : vector<8xf32>
    %36 = vector.multi_reduction <maximumf>, %35, %cst_13 [1] : vector<8x8xf32> to vector<8xf32>
    %37 = vector.shape_cast %36 : vector<8xf32> to vector<8x1xf32>
    %38 = vector.broadcast %37 : vector<8x1xf32> to vector<8x8xf32>
    %39 = arith.subf %35, %38 : vector<8x8xf32>
    %40 = math.exp %39 : vector<8x8xf32>
    %cst_14 = arith.constant dense<0.000000e+00> : vector<8xf32>
    %41 = vector.multi_reduction <add>, %40, %cst_14 [1] : vector<8x8xf32> to vector<8xf32>
    %42 = vector.shape_cast %41 : vector<8xf32> to vector<8x1xf32>
    %43 = tpu.reciprocal %42 {approx = true} : vector<8x1xf32> -> vector<8x1xf32>
    %44 = vector.broadcast %43 : vector<8x1xf32> to vector<8x8xf32>
    %45 = arith.mulf %40, %44 : vector<8x8xf32>
    %46 = arith.truncf %45 : vector<8x8xf32> to vector<8x8xbf16>
    %cst_15 = arith.constant dense<0.000000e+00> : vector<8x8xf32>
    %47 = tpu.matmul %46, %34, %cst_15 {dimension_numbers = #tpu.dot_dimension_numbers<[1], [0], [0], [1], [0, 0, 1, 1], [], []>} : vector<8x8xbf16>, vector<8x8xbf16>, vector<8x8xf32> -> vector<8x8xf32>
    %48 = vector.extract_strided_slice %14 {offsets = [0, 16], sizes = [8, 8], strides = [1, 1]} : vector<8x32xbf16> to vector<8x8xbf16>
    %49 = vector.extract_strided_slice %15 {offsets = [0, 16], sizes = [8, 8], strides = [1, 1]} : vector<8x64xbf16> to vector<8x8xbf16>
    %50 = vector.extract_strided_slice %15 {offsets = [0, 48], sizes = [8, 8], strides = [1, 1]} : vector<8x64xbf16> to vector<8x8xbf16>
    %cst_16 = arith.constant dense<0.000000e+00> : vector<8x8xf32>
    %51 = tpu.matmul %48, %49, %cst_16 {dimension_numbers = #tpu.dot_dimension_numbers<[1], [1], [0], [0], [0, 0, 1, 0], [], []>} : vector<8x8xbf16>, vector<8x8xbf16>, vector<8x8xf32> -> vector<8x8xf32>
    %cst_17 = arith.constant dense<0xFF800000> : vector<8xf32>
    %52 = vector.multi_reduction <maximumf>, %51, %cst_17 [1] : vector<8x8xf32> to vector<8xf32>
    %53 = vector.shape_cast %52 : vector<8xf32> to vector<8x1xf32>
    %54 = vector.broadcast %53 : vector<8x1xf32> to vector<8x8xf32>
    %55 = arith.subf %51, %54 : vector<8x8xf32>
    %56 = math.exp %55 : vector<8x8xf32>
    %cst_18 = arith.constant dense<0.000000e+00> : vector<8xf32>
    %57 = vector.multi_reduction <add>, %56, %cst_18 [1] : vector<8x8xf32> to vector<8xf32>
    %58 = vector.shape_cast %57 : vector<8xf32> to vector<8x1xf32>
    %59 = tpu.reciprocal %58 {approx = true} : vector<8x1xf32> -> vector<8x1xf32>
    %60 = vector.broadcast %59 : vector<8x1xf32> to vector<8x8xf32>
    %61 = arith.mulf %56, %60 : vector<8x8xf32>
    %62 = arith.truncf %61 : vector<8x8xf32> to vector<8x8xbf16>
    %cst_19 = arith.constant dense<0.000000e+00> : vector<8x8xf32>
    %63 = tpu.matmul %62, %50, %cst_19 {dimension_numbers = #tpu.dot_dimension_numbers<[1], [0], [0], [1], [0, 0, 1, 1], [], []>} : vector<8x8xbf16>, vector<8x8xbf16>, vector<8x8xf32> -> vector<8x8xf32>
    %64 = vector.extract_strided_slice %14 {offsets = [0, 24], sizes = [8, 8], strides = [1, 1]} : vector<8x32xbf16> to vector<8x8xbf16>
    %65 = vector.extract_strided_slice %15 {offsets = [0, 24], sizes = [8, 8], strides = [1, 1]} : vector<8x64xbf16> to vector<8x8xbf16>
    %66 = vector.extract_strided_slice %15 {offsets = [0, 56], sizes = [8, 8], strides = [1, 1]} : vector<8x64xbf16> to vector<8x8xbf16>
    %cst_20 = arith.constant dense<0.000000e+00> : vector<8x8xf32>
    %67 = tpu.matmul %64, %65, %cst_20 {dimension_numbers = #tpu.dot_dimension_numbers<[1], [1], [0], [0], [0, 0, 1, 0], [], []>} : vector<8x8xbf16>, vector<8x8xbf16>, vector<8x8xf32> -> vector<8x8xf32>
    %cst_21 = arith.constant dense<0xFF800000> : vector<8xf32>
    %68 = vector.multi_reduction <maximumf>, %67, %cst_21 [1] : vector<8x8xf32> to vector<8xf32>
    %69 = vector.shape_cast %68 : vector<8xf32> to vector<8x1xf32>
    %70 = vector.broadcast %69 : vector<8x1xf32> to vector<8x8xf32>
    %71 = arith.subf %67, %70 : vector<8x8xf32>
    %72 = math.exp %71 : vector<8x8xf32>
    %cst_22 = arith.constant dense<0.000000e+00> : vector<8xf32>
    %73 = vector.multi_reduction <add>, %72, %cst_22 [1] : vector<8x8xf32> to vector<8xf32>
    %74 = vector.shape_cast %73 : vector<8xf32> to vector<8x1xf32>
    %75 = tpu.reciprocal %74 {approx = true} : vector<8x1xf32> -> vector<8x1xf32>
    %76 = vector.broadcast %75 : vector<8x1xf32> to vector<8x8xf32>
    %77 = arith.mulf %72, %76 : vector<8x8xf32>
    %78 = arith.truncf %77 : vector<8x8xf32> to vector<8x8xbf16>
    %cst_23 = arith.constant dense<0.000000e+00> : vector<8x8xf32>
    %79 = tpu.matmul %78, %66, %cst_23 {dimension_numbers = #tpu.dot_dimension_numbers<[1], [0], [0], [1], [0, 0, 1, 1], [], []>} : vector<8x8xbf16>, vector<8x8xbf16>, vector<8x8xf32> -> vector<8x8xf32>
    %80 = tpu.concatenate %31, %47, %63, %79 in 1 : vector<8x8xf32>, vector<8x8xf32>, vector<8x8xf32>, vector<8x8xf32> -> vector<8x32xf32>
    %81 = arith.truncf %80 : vector<8x32xf32> to vector<8x32xbf16>
    %c0_24 = arith.constant 0 : index
    %c0_25 = arith.constant 0 : index
    %82 = vector.load %arg7[%c0_24, %c0_25] : memref<32x32xbf16, #tpu.memory_space<vmem>>, vector<32x32xbf16>
    %cst_26 = arith.constant dense<0.000000e+00> : vector<8x32xf32>
    %83 = tpu.matmul %81, %82, %cst_26 {dimension_numbers = #tpu.dot_dimension_numbers<[1], [0], [0], [1], [0, 0, 1, 1], [], []>} : vector<8x32xbf16>, vector<32x32xbf16>, vector<8x32xf32> -> vector<8x32xf32>
    %c0_27 = arith.constant 0 : index
    %c0_28 = arith.constant 0 : index
    %84 = vector.load %arg8[%c0_27, %c0_28] : memref<1x32xf32, #tpu.memory_space<vmem>>, vector<1x32xf32>
    %85 = vector.broadcast %84 : vector<1x32xf32> to vector<8x32xf32>
    %86 = arith.addf %83, %85 : vector<8x32xf32>
    %c0_29 = arith.constant 0 : index
    %c0_30 = arith.constant 0 : index
    %c0_31 = arith.constant 0 : index
    %87 = vector.load %arg9[%c0_29, %c0_30, %c0_31] : memref<1x8x32xf32, #tpu.memory_space<vmem>>, vector<1x8x32xf32>
    %88 = vector.shape_cast %87 : vector<1x8x32xf32> to vector<8x32xf32>
    %89 = vector.shape_cast %86 : vector<8x32xf32> to vector<1x8x32xf32>
    tpu.vector_store %arg9[%c0_29, %c0_30, %c0_31], %89 {strides = array<i32>} : memref<1x8x32xf32, #tpu.memory_space<vmem>>, vector<1x8x32xf32>,
    return
  }
  func.func @transform_0(%arg0: i32, %arg1: i32) -> (i32, i32, i32) {
    %c0_i32 = arith.constant 0 : i32
    %c0_i32_0 = arith.constant 0 : i32
    %c0_i32_1 = arith.constant 0 : i32
    return %arg0, %c0_i32, %c0_i32_0 : i32, i32, i32
  }
  func.func @transform_1(%arg0: i32, %arg1: i32) -> (i32, i32) {
    %c0_i32 = arith.constant 0 : i32
    %c0_i32_0 = arith.constant 0 : i32
    %c0_i32_1 = arith.constant 0 : i32
    return %c0_i32, %c0_i32_0 : i32, i32
  }
  func.func @transform_2(%arg0: i32, %arg1: i32) -> (i32, i32) {
    %c0_i32 = arith.constant 0 : i32
    %c0_i32_0 = arith.constant 0 : i32
    %c0_i32_1 = arith.constant 0 : i32
    return %c0_i32, %c0_i32_0 : i32, i32
  }
  func.func @transform_3(%arg0: i32, %arg1: i32) -> (i32, i32) {
    %c0_i32 = arith.constant 0 : i32
    %c0_i32_0 = arith.constant 0 : i32
    %c0_i32_1 = arith.constant 0 : i32
    return %c0_i32, %c0_i32_0 : i32, i32
  }
  func.func @transform_4(%arg0: i32, %arg1: i32) -> (i32, i32) {
    %c0_i32 = arith.constant 0 : i32
    %c0_i32_0 = arith.constant 0 : i32
    %c0_i32_1 = arith.constant 0 : i32
    return %c0_i32, %c0_i32_0 : i32, i32
  }
  func.func @transform_5(%arg0: i32, %arg1: i32) -> (i32, i32) {
    %c0_i32 = arith.constant 0 : i32
    %c0_i32_0 = arith.constant 0 : i32
    %c0_i32_1 = arith.constant 0 : i32
    return %c0_i32, %c0_i32_0 : i32, i32
  }
  func.func @transform_6(%arg0: i32, %arg1: i32) -> (i32, i32) {
    %c0_i32 = arith.constant 0 : i32
    %c0_i32_0 = arith.constant 0 : i32
    %c0_i32_1 = arith.constant 0 : i32
    return %c0_i32, %c0_i32_0 : i32, i32
  }
  func.func @transform_7(%arg0: i32, %arg1: i32) -> (i32, i32, i32) {
    %c0_i32 = arith.constant 0 : i32
    %c0_i32_0 = arith.constant 0 : i32
    return %arg0, %arg1, %c0_i32 : i32, i32, i32
  }
}

</mosaic_0001>

<bundles_post_ra>
// kernel: multi_head_attention_forward.1
= control target key start
LH: loop header
LB: loop body
LE: loop exit
PB: predicated region body
PF: predicated region fallthrough
CT: control target
= control target key end

     0   :  { %s1680_s0 = inlined_call_operand.hbm [shape: f32[2,8,32], index: 0, kind: input, shape index: {}]   ;;  %s1681_s1 = inlined_call_operand.hbm [shape: bf16[32,32], index: 1, kind: input, shape index: {}]   ;;  %s1682_s2 = inlined_call_operand.vmem [shape: f32[1,32], index: 2, kind: input, shape index: {}]   ;;  %s1683_s3 = inlined_call_operand.hbm [shape: bf16[32,64], index: 3, kind: input, shape index: {}]   ;;  %s1684_s4 = inlined_call_operand.hbm [shape: f32[1,64], index: 4, kind: input, shape index: {}]   ;;  %s1685_s5 = inlined_call_operand.hbm [shape: bf16[32,32], index: 5, kind: input, shape index: {}]   ;;  %s1686_s6 = inlined_call_operand.hbm [shape: f32[1,32], index: 6, kind: input, shape index: {}]   ;;  %s1687_s7 = inlined_call_operand.hbm [shape: f32[2,8,32], index: 7, kind: output, shape index: {}]  }
   0x1   :  { %1689 = sst [smem:[#allocation20_spill]] %s1681_s1 }
   0x2   :  { %1690 = sst [smem:[#allocation21_spill]] %s1683_s3 }
   0x3   :  { %12 = vsyncpa [#allocation4], 0 }
   0x4   :  { %14 = vsyncpa [#allocation4 + $0x1], 0 }
   0x5   :  { %15 = vsyncpa [#allocation7], 0 }
   0x6   :  { %16 = vsyncpa [#allocation10], 0 }
   0x7   :  { %17 = vsyncpa [#allocation13], 0 }
   0x8   :  { %18 = vsyncpa [#allocation5], 0 }
   0x9   :  { %20 = vsyncpa [#allocation5 + $0x1], 0  ;;  %s1449_s24 = smov 0   ;;  %s1451_s25 = smov 0  }
   0xa   :  { %s1453_s26 = smov 0   ;;  %s1455_s27 = smov 0  }
   0xb   :  { %s1457_s28 = smov 0   ;;  %s1459_s29 = smov 0  }
   0xc LB: > { %s1688_s30 = sadd.s32 4294967295, %s1390_s29   ;;  %p910_p0 = scmp.ge.s32.totalorder %s1390_s29, 1  ;;  %s1390_s29 = sphi %s1459_s29, %s26_s29   ;;  %s1386_s28 = sphi %s1457_s28, %s1705_s28   ;;  %s1382_s27 = sphi %s1455_s27, %s1704_s27   ;;  %s1378_s26 = sphi %s1453_s26, %s1703_s26   ;;  %s1374_s25 = sphi %s1451_s25, %s1702_s25   ;;  %s1370_s24 = sphi %s1449_s24, %s1701_s24  }
   0xd   : > { %p1483_p1 = scmp.eq.s32.totalorder %s1688_s30, 0  ;;  %p223_p2 = scmp.lt.s32.totalorder %s1390_s29, 3 }
   0xe   : > { %s1692_s1 = sld [smem:[#allocation20_spill]]  ;;  %s1392_s13 = smov [#allocation6]  }
   0xf   : > { %p1491_p3 = pnand %p910_p0, %p223_p2  ;;  %s236_s14 = sshll.u32 %s1392_s13, 4  ;;  %s237_s14 = int_to_ptr.vmem [resolvable:$true] %s236_s14 }
  0x10   : > { %p916_p6 = scmp.ge.s32.totalorder %s1390_s29, 2  ;;  %s266_s18 = sshll.u32 %s1684_s4, 4  ;;  %s267_s18 = int_to_ptr.hbm [resolvable:$true] %s266_s18 }
  0x11   : > { %p996_p4 = pneg %p1491_p3  ;;  %s1393_s19 = smov 64  }
  0x12   : > { %s1394_s20 = smov 4   ;;  %s1395_s21 = smov [#allocation9]  }
  0x13   : > { %p1499_p5 = pnand %p996_p4, %p1483_p1  ;;  %s268_s22 = sshll.u32 %s1395_s21, 4  ;;  %s269_s22 = int_to_ptr.vmem [resolvable:$true] %s268_s22 }
  0x14   : > { %s234_s11 = sshll.u32 %s1692_s1, 4  ;;  %s1695_s3 = sld [smem:[#allocation21_spill]]  ;;  %s235_s11 = int_to_ptr.hbm [resolvable:$true] %s234_s11 }
  0x15   : > { %999 = dma.hbm_to_vmem [thread:$0]  (!%p1499_p5), %s235_s11, 256, %s237_s14, [#allocation7], %s1393_s19, %s1393_s19, %s1394_s20  }
  0x16   : > { %1005 = dma.hbm_to_vmem [thread:$0]  (!%p1499_p5), %s267_s18, 16, %s269_s22, [#allocation10]  }
  0x17   : > { %s277_s17 = sshll.u32 %s1685_s5, 4  ;;  %s1396_s30 = smov [#allocation8]   ;;  %s278_s17 = int_to_ptr.hbm [resolvable:$true] %s277_s17 }
  0x18   : > { %s253_s11 = sshll.u32 %s1396_s30, 4  ;;  %s1397_s14 = smov [#allocation11]   ;;  %s254_s11 = int_to_ptr.vmem [resolvable:$true] %s253_s11 }
  0x19   : > { %s279_s18 = sshll.u32 %s1397_s14, 4  ;;  %s292_s23 = sshll.u32 %s1686_s6, 4  ;;  %s280_s18 = int_to_ptr.vmem [resolvable:$true] %s279_s18  ;;  %s293_s23 = int_to_ptr.hbm [resolvable:$true] %s292_s23 }
  0x1a   : > { %s251_s10 = sshll.u32 %s1695_s3, 4  ;;  %s1398_s30 = smov [#allocation12]   ;;  %s252_s10 = int_to_ptr.hbm [resolvable:$true] %s251_s10 }
  0x1b   : > { %1002 = dma.hbm_to_vmem [thread:$0]  (!%p1499_p5), %s252_s10, 256, %s254_s11, [#allocation7], %s1393_s19, %s1393_s19, %s1394_s20  }
  0x1c   : > { %1008 = dma.hbm_to_vmem [thread:$0]  (!%p1499_p5), %s278_s17, 256, %s280_s18, [#allocation10], %s1393_s19, %s1393_s19, %s1394_s20  }
  0x1d   : > { %s294_s9 = sshll.u32 %s1398_s30, 4  ;;  %s909_s10 = sadd.s32 4294967294, %s1390_s29   ;;  %s295_s9 = int_to_ptr.vmem [resolvable:$true] %s294_s9 }
  0x1e   : > { %1011 = dma.hbm_to_vmem [thread:$0]  (!%p1499_p5), %s293_s23, 16, %s295_s9, [#allocation13]  }
  0x1f   : > { %s38_s13 = sadd.s32 1, %s1386_s28  ;;  %s45_s16 = sadd.s32 1, %s1378_s26 }
  0x20   : > { %p40_p7 = scmp.ge.s32.totalorder %s38_s13, 2  ;;  %p52_p8 = scmp.ne.s32.totalorder %s1378_s26, %s1374_s25 }
  0x21   : > { %p53_p9 = scmp.eq.s32.totalorder %s1390_s29, 0  ;;  %p58_p10 = scmp.ne.s32.totalorder %s1374_s25, %s1370_s24 }
  0x22   : > { %s1707_s13 = smov (%p40_p7, %s38_s13), 0  ;;  %s1698_s17 = sadd.s32 4294967295, %s1390_s29  }
  0x23   : > { %p1536_p11 = por %p53_p9, %p52_p8  ;;  %p1542_p12 = por %p1483_p1, %p58_p10 }
  0x24   : > { %s42_s20 = ssub.s32 %s1386_s28, %s1707_s13  ;;  %p210_p13 = scmp.eq.s32.totalorder %s1698_s17, 1 }
  0x25   : > { %p43_p0 = scmp.eq.s32.totalorder %s42_s20, 0  ;;  %p216_p2 = scmp.eq.s32.totalorder %s909_s10, 1 }
  0x26   : > { %p1550_p4 = por %p210_p13, %p52_p8  ;;  %p1025_p5 = scmp.lt.s32.totalorder %s1390_s29, 2 }
  0x27   : > { %s1556_s14 = scalar_select %p43_p0, %s1378_s26, %s45_s16  }
  0x28   : > { %p1558_p7 = por %p216_p2, %p58_p10  ;;  %s305_s21 = sand.u32 1, %s1378_s26  }
  0x29   : > { %s917_s22 = sshll.u32 %s305_s21, 3  ;;  %s918_s23 = sshll.u32 %s1386_s28, 3 }
  0x2a   : > { %s313_s17 = scalar_lea.hbm %s1680_s0, %s918_s23  ;;  %s309_s20 = scalar_lea.vmem [#allocation3], %s917_s22 }
  0x2b   : > { %s317_s10 = sshll.u32 %s309_s20, 4  ;;  %s315_s1 = sshll.u32 %s313_s17, 4  ;;  %s318_s10 = int_to_ptr.vmem [resolvable:$true] %s317_s10  ;;  %s316_s1 = int_to_ptr.hbm [resolvable:$true] %s315_s1 }
  0x2c   : > { %p1013_p8 = pnand %p1025_p5, %p1536_p11  ;;  %s306_s16 = scalar_lea.sflag [#allocation4], %s305_s21 }
  0x2d   : > { %326 = sbr.rel (%p1491_p3) target bundleno = 1390 (0x56e), region = 48  ;;  %s1572_s3 = sand.u32 (!%p1491_p3), 1, %s1374_s25  }
  0x2e   : > { %1015 = dma.hbm_to_vmem [thread:$0]  (!%p1013_p8), %s316_s1, 128, %s318_s10, %s306_s16  }
  0x2f   : > { %s920_s23 = sshll.u32 (!%p1491_p3), %s1572_s3, 3  ;;  %s329_s22 = scalar_lea.sflag (!%p1491_p3), [#allocation4], %s1572_s3 }
  0x30   : > { %s332_s30 = scalar_lea.vmem (!%p1491_p3), [#allocation3], %s920_s23 }
  0x32   : > { %1349 = dma.done.wait (%p1542_p12), %s329_s22, 128  }
  0x33   : > { %1351 = vsyncadd (%p1542_p12), %s329_s22, 4294967168 }
  0x34   : > { %1353 = dma.done.wait (%p1483_p1), [#allocation7], 512  }
  0x35   : > { %1355 = vsyncadd (%p1483_p1), [#allocation7], 4294966784 }
  0x36   : > { %1357 = dma.done.wait (%p1483_p1), [#allocation10], 272  }
  0x37   : > { %1359 = vsyncadd (%p1483_p1), [#allocation10], 4294967024 }
  0x38   : > { %1361 = dma.done.wait (%p1483_p1), [#allocation13], 16  }
  0x39   : > { %1363 = vsyncadd (%p1483_p1), [#allocation13], 4294967280  ;;  %v967_v0 = vld [vmem:[#allocation8 + $0x8] sm:$0xff]  ;;  %v969_v1 = vld [vmem:[#allocation6 + $0x8] sm:$0xff]  ;;  %vm416_vm0 = vcmask 261120   ;;  %vm434_vm1 = vcmask 519168  }
  0x3a   : > { %v966_v2 = vld [vmem:[#allocation8] sm:$0xff]  ;;  %v968_v3 = vld [vmem:[#allocation6] sm:$0xff]  ;;  %426 = vmatpush.bf16.msra.mxu0 %v967_v0  ;;  %470 = vmatpush.bf16.msra.mxu1 %v969_v1  ;;  %v1098_v7 = vld [vmem:[%s1682_s2] ss:$0 sm:$0xff]  ;;  %s1399_s8 = smov 120   ;;  %vm479_vm2 = vcmask 64512  }
  0x3b   : > { %v394_v4 = vld [vmem:[%s332_s30] sm:$0xff]  ;;  %v1097_v6 = vld [vmem:[#allocation9] ss:$0 sm:$0xff]  ;;  %s1400_s19 = smov 112   ;;  %s1401_s15 = smov 96   ;;  %vm519_vm3 = vcmask 1043456  }
  0x3c   : > { %v395_v5 = vpack.c.bf16 %v394_v4, %v394_v4  ;;  %s1402_s21 = smov 104   ;;  %s1403_s9 = smov 88   ;;  %vm720_vm4 = vcmask 130048   ;;  %vm722_vm5 = vcmask 195584  }
  0x3d   : > { %s1404_s17 = smov 80   ;;  %s1405_s20 = smov 72  }
  0x3e   : > { %427 = vmatpush.bf16.msra.mxu0 %v966_v2  ;;  %471 = vmatpush.bf16.msra.mxu1 %v968_v3  ;;  %s1406_s10 = smov 8   ;;  %s1407_s16 = smov 16  }
  0x3f   : > { %s1408_s22 = smov 24   ;;  %s963_s30 = sshll.u32 %s1382_s27, 3 }
  0x41   : > { %935 = vmatmul.msk.bf16.vlgmr.msra.gmra.mxu0 %vm416_vm0, %v395_v5  ;;  %944 = vmatmul.msk.bf16.vlgmr.msra.gmra.mxu1 %vm416_vm0, %v395_v5 }
  0xbe   : > { %v429_v8 = vpop.f32.mrf.mxu0  ;;  %v473_v9 = vpop.f32.mrf.mxu1 }
  0xbf   : > { %v430_v10 = vadd.f32 %v1097_v6, %v429_v8  ;;  %v474_v11 = vadd.f32 %v1098_v7, %v473_v9 }
  0xc1   : > { %v433_v12 = vpack.c.bf16 %v430_v10, %v430_v10  ;;  %v477_v13 = vpack.c.bf16 %v474_v11, %v474_v11 }
  0xc3   : > { %435 = vst.msk [vmem:[#allocation2] sm:$0xf] %vm434_vm1, %v433_v12  ;;  %v537_v14 = vunpack.c.l.b16 %v477_v13 }
  0xc5   : > { %v538_v15 = vpack.c.b16 %v537_v14, %v537_v14 }
  0xc6   : > { %v431_v16 = vpop.f32.mrf.mxu0  ;;  %v475_v17 = vpop.f32.mrf.mxu1 }
  0xc7   : > { %539 = vrot.lane.b32.xlu2 %v538_v15, %s1399_s8 }
  0xca   : > { %v478_v18 = vld [vmem:[#allocation2] sm:$0xf] }
  0xcb   : > { %v484_v19 = vsel %vm479_vm2, %v478_v18, 0  ;;  %v512_v20 = vunpack.c.l.b16 %v478_v18 }
  0xcc   : > { %493 = vmatpush.bf16.xpose.msra.mxu2 %v484_v19 }
  0xcd   : > { %v1600_v21 = vpack.c.b16 %v512_v20, %v512_v20 }
  0xcf   : > { %597 = vrot.lane.b32.xlu2 %v1600_v21, %s1400_s19  ;;  %514 = vrot.lane.b32.xlu1 %v1600_v21, %s1401_s15 }
  0xd3   : > { %945 = vmatmul.msk.bf16.vlgmr.msra.gmra.mxu2 %vm479_vm2, %v477_v13 }
  0xd7   : > { %651 = vrot.lane.b32.xlu2 %v538_v15, %s1402_s21  ;;  %541 = vrot.lane.b32.xlu1 %v1600_v21, %s1399_s8  ;;  %s774_s8 = scalar_lea.hbm %s1687_s7, %s963_s30 }
  0xdf   : > { %595 = vrot.lane.b32.xlu1 %v538_v15, %s1400_s19  ;;  %s388_s19 = scalar_lea.vmem [#allocation14], %s920_s23  ;;  %s1316_s23 = scalar_lea.hbm %s1687_s7, 16 }
  0xe0   : > { %s776_s15 = sshll.u32 %s388_s19, 4  ;;  %s777_s15 = int_to_ptr.vmem [resolvable:$true] %s776_s15 }
 0x121   : > { %v540_v22 = vpop.permute.xlu2 %539 }
 0x129   : > { %v598_v23 = vpop.permute.xlu2 %597 }
 0x12a   : > { %v603_v24 = vsel %vm479_vm2, %v598_v23, 0 }
 0x12b   : > { %612 = vmatpush.bf16.xpose.msrb.mxu1 %v603_v24 }
 0x131   : > { %v652_v41 = vpop.permute.xlu2 %651 }
 0x141   : > { %v515_v25 = vpop.permute.xlu1 %514 }
 0x142   : > { %v521_v26 = vsel %vm519_vm3, %v515_v25, 0 }
 0x143   : > { %530 = vmatpush.bf16.msra.mxu3 %v521_v26 }
 0x149   : > { %v542_v27 = vpop.permute.xlu1 %541 }
 0x14a   : > { %v547_v28 = vsel %vm479_vm2, %v542_v27, 0 }
 0x14b   : > { %556 = vmatpush.bf16.xpose.msrb.mxu3 %v547_v28 }
 0x151   : > { %v596_v29 = vpop.permute.xlu1 %595 }
 0x152   : > { %949 = vmatmul.msk.bf16.vlgmr.msrb.gmra.mxu1 %vm479_vm2, %v596_v29 }
 0x156   : > { %v495_v30 = vpop.f32.mrf.mxu2 }
 0x157   : > { %v499_v31 = vsel %vm479_vm2, %v495_v30, -inf }
 0x158   : > { %500 = vmax.xlane.f32.xlu0 %v499_v31  ;;  %v971_v31 = vld [vmem:[#allocation11 + $0x8] sm:$0xff] }
 0x159   : > { %754 = vmatpush.bf16.msra.mxu1 %v971_v31 }
 0x15e   : > { %v497_v32 = vpop.f32.mrf.mxu2 }
 0x15f   : > { %v970_v32 = vld [vmem:[#allocation11] sm:$0xff] }
 0x160   : > { %755 = vmatpush.bf16.msra.mxu1 %v970_v32 }
 0x1cb   : > { %v501_v33 = vpop.xlane.xlu0 %500 }
 0x1cc   : > { %v502_v34 = vsub.f32 %v495_v30, %v501_v33 }
 0x1ce   : > { %v503_v35 = vmul.f32 1.442695, %v502_v34 }
 0x1cf   : > { %v614_v36 = vpop.f32.mrf.mxu1 }
 0x1d0   : > { %1100 = vpow2.f32 %v503_v35  ;;  %v618_v37 = vsel %vm479_vm2, %v614_v36, -inf }
 0x1d1   : > { %619 = vmax.xlane.f32.xlu2 %v618_v37 }
 0x1d6   : > { %v1101_v38 = vpop.eup %1100 }
 0x1d7   : > { %v616_v39 = vpop.f32.mrf.mxu1  ;;  %v505_v40 = vsel %vm479_vm2, %v1101_v38, 0.0 }
 0x1d8   : > { %506 = vadd.xlane.f32.xlu0 %v505_v40  ;;  %v1099_v40 = vld [vmem:[#allocation12] ss:$0 sm:$0xff] }
 0x1ec   : > { %653 = vrot.lane.b32.xlu0 %v1600_v21, %s1402_s21  ;;  %s778_s21 = sshll.u32 %s774_s8, 4  ;;  %s779_s21 = int_to_ptr.hbm [resolvable:$true] %s778_s21 }
 0x244   : > { %v620_v42 = vpop.xlane.xlu2 %619 }
 0x245   : > { %v621_v43 = vsub.f32 %v614_v36, %v620_v42 }
 0x247   : > { %v622_v44 = vmul.f32 1.442695, %v621_v43 }
 0x249   : > { %1102 = vpow2.f32 %v622_v44 }
 0x24b   : > { %v507_v45 = vpop.xlane.xlu0 %506 }
 0x24c   : > { %1104 = vrcp.f32 %v507_v45 }
 0x24f   : > { %v1103_v46 = vpop.eup %1102 }
 0x250   : > { %v624_v47 = vsel %vm479_vm2, %v1103_v46, 0.0 }
 0x251   : > { %625 = vadd.xlane.f32.xlu2 %v624_v47 }
 0x252   : > { %v1105_v48 = vpop.eup %1104 }
 0x253   : > { %v509_v49 = vmul.f32 %v1105_v48, %v1101_v38 }
 0x255   : > { %v510_v50 = vpack.c.bf16 %v509_v49, %v509_v49 }
 0x257   : > { %946 = vmatmul.msk.bf16.vlgmr.msra.gmra.mxu3 %vm479_vm2, %v510_v50 }
 0x25e   : > { %v654_v51 = vpop.permute.xlu0 %653 }
 0x25f   : > { %v659_v52 = vsel %vm479_vm2, %v654_v51, 0 }
 0x260   : > { %668 = vmatpush.bf16.xpose.msra.mxu3 %v659_v52 }
 0x267   : > { %947 = vmatmul.msk.bf16.vlgmr.msrb.gmra.mxu3 %vm479_vm2, %v540_v22 }
 0x277   : > { %951 = vmatmul.msk.bf16.vlgmr.msra.gmra.mxu3 %vm479_vm2, %v652_v41 }
 0x2c4   : > { %v626_v9 = vpop.xlane.xlu2 %625 }
 0x2da   : > { %v1621_v53 = vpop.f32.mrf.mxu3 }
 0x2e2   : > { %v534_v54 = vpop.f32.mrf.mxu3 }
 0x2ea   : > { %v558_v55 = vpop.f32.mrf.mxu3 }
 0x2eb   : > { %v562_v56 = vsel %vm479_vm2, %v558_v55, -inf }
 0x2ec   : > { %563 = vmax.xlane.f32.xlu1 %v562_v56 }
 0x2f2   : > { %v560_v57 = vpop.f32.mrf.mxu3 }
 0x2fa   : > { %v670_v58 = vpop.f32.mrf.mxu3 }
 0x2fb   : > { %v674_v59 = vsel %vm479_vm2, %v670_v58, -inf }
 0x2fc   : > { %675 = vmax.xlane.f32.xlu0 %v674_v59 }
 0x302   : > { %v672_v60 = vpop.f32.mrf.mxu3 }
 0x305   : > { %574 = vrot.lane.b32.xlu1 %v1600_v21, %s1403_s9  ;;  %s763_s9 = scalar_lea.sflag [#allocation5], %s1572_s3 }
 0x35f   : > { %v564_v61 = vpop.xlane.xlu1 %563 }
 0x360   : > { %v565_v62 = vsub.f32 %v558_v55, %v564_v61 }
 0x362   : > { %v566_v63 = vmul.f32 1.442695, %v565_v62 }
 0x364   : > { %1106 = vpow2.f32 %v566_v63 }
 0x36a   : > { %v1107_v0 = vpop.eup %1106 }
 0x36b   : > { %v568_v1 = vsel %vm479_vm2, %v1107_v0, 0.0 }
 0x36c   : > { %569 = vadd.xlane.f32.xlu2 %v568_v1 }
 0x36f   : > { %v676_v2 = vpop.xlane.xlu0 %675 }
 0x370   : > { %v677_v3 = vsub.f32 %v670_v58, %v676_v2 }
 0x372   : > { %v678_v4 = vmul.f32 1.442695, %v677_v3 }
 0x374   : > { %1108 = vpow2.f32 %v678_v4 }
 0x375   : > { %1110 = vrcp.f32 %v626_v9 }
 0x377   : > { %v575_v5 = vpop.permute.xlu1 %574 }
 0x378   : > { %v580_v6 = vsel %vm519_vm3, %v575_v5, 0 }
 0x379   : > { %589 = vmatpush.bf16.msrb.mxu0 %v580_v6 }
 0x37a   : > { %v1109_v7 = vpop.eup %1108 }
 0x37b   : > { %v680_v8 = vsel %vm479_vm2, %v1109_v7, 0.0  ;;  %v1111_v11 = vpop.eup %1110 }
 0x37c   : > { %681 = vadd.xlane.f32.xlu0 %v680_v8  ;;  %v628_v13 = vmul.f32 %v1111_v11, %v1103_v46 }
 0x37e   : > { %v629_v18 = vpack.c.bf16 %v628_v13, %v628_v13 }
 0x384   : > { %630 = vrot.lane.b32.xlu2 %v1600_v21, %s1404_s17  ;;  %s1310_s17 = sshra.s32 %s779_s21, 4  ;;  %s1311_s17 = int_to_ptr.hbm [resolvable:$true] %s1310_s17 }
 0x385   : > { %s1312_s27 = scalar_lea.hbm %s1311_s17, 8  ;;  %p1317_p10 = scmp.lt.s32.totalorder %s1311_s17, %s1687_s7 }
 0x386   : > { %p1313_p1 = scmp.ne.s32.totalorder %s1311_s17, %s1312_s27  ;;  %p1318_p11 = scmp.lt.s32.totalorder %s1316_s23, %s1312_s27 }
 0x388   : > { %p1314_p3 = pnand %p1313_p1, %p1550_p4  ;;  %p1319_p12 = por %p1318_p11, %p1317_p10 }
 0x38a   : > { %p1315_p9 = pneg %p1314_p3 }
 0x38c   : > { %p1320_p13 = pnand %p1319_p12, %p1315_p9 }
 0x390   : > { %686 = vrot.lane.b32.xlu0 %v1600_v21, %s1405_s20 }
 0x3df   : > { %v570_v10 = vpop.xlane.xlu2 %569 }
 0x3e0   : > { %1112 = vrcp.f32 %v570_v10 }
 0x3e6   : > { %v1113_v12 = vpop.eup %1112 }
 0x3e7   : > { %v572_v14 = vmul.f32 %v1113_v12, %v1107_v0  ;;  %v631_v15 = vpop.permute.xlu2 %630 }
 0x3e8   : > { %v636_v16 = vsel %vm519_vm3, %v631_v15, 0 }
 0x3e9   : > { %645 = vmatpush.bf16.msrb.mxu2 %v636_v16  ;;  %v573_v17 = vpack.c.bf16 %v572_v14, %v572_v14 }
 0x3eb   : > { %948 = vmatmul.msk.bf16.vlgmr.msrb.gmra.mxu0 %vm479_vm2, %v573_v17 }
 0x3ec   : > { %950 = vmatmul.msk.bf16.vlgmr.msrb.gmra.mxu2 %vm479_vm2, %v629_v18 }
 0x3ef   : > { %v682_v19 = vpop.xlane.xlu0 %681 }
 0x3f0   : > { %1114 = vrcp.f32 %v682_v19 }
 0x3f6   : > { %v1115_v20 = vpop.eup %1114 }
 0x3f7   : > { %v684_v21 = vmul.f32 %v1115_v20, %v1109_v7 }
 0x3f9   : > { %v685_v24 = vpack.c.bf16 %v684_v21, %v684_v21 }
 0x402   : > { %v687_v22 = vpop.permute.xlu0 %686 }
 0x403   : > { %v692_v23 = vsel %vm519_vm3, %v687_v22, 0 }
 0x404   : > { %701 = vmatpush.bf16.msra.mxu0 %v692_v23 }
 0x407   : > { %952 = vmatmul.msk.bf16.vlgmr.msra.gmra.mxu0 %vm479_vm2, %v685_v24 }
 0x468   : > { %v591_v25 = vpop.f32.mrf.mxu0 }
 0x469   : > { %708 = vrot.lane.b32.xlu1 %v591_v25, %s1406_s10 }
 0x46f   : > { %v647_v26 = vpop.f32.mrf.mxu2 }
 0x470   : > { %v593_v27 = vpop.f32.mrf.mxu0 }
 0x471   : > { %712 = vrot.lane.b32.xlu1 %v647_v26, %s1407_s16 }
 0x477   : > { %v649_v28 = vpop.f32.mrf.mxu2 }
 0x484   : > { %v703_v29 = vpop.f32.mrf.mxu0 }
 0x485   : > { %716 = vrot.lane.b32.xlu2 %v703_v29, %s1408_s22 }
 0x48c   : > { %v705_v30 = vpop.f32.mrf.mxu0 }
 0x4db   : > { %v709_v33 = vpop.permute.xlu1 %708 }
 0x4dc   : > { %v719_v34 = vsel %vm479_vm2, %v1621_v53, %v709_v33 }
 0x4df   : > { %v717_v36 = vpop.permute.xlu2 %716 }
 0x4e3   : > { %v713_v35 = vpop.permute.xlu1 %712 }
 0x4e4   : > { %v721_v37 = vsel %vm720_vm4, %v719_v34, %v713_v35 }
 0x4e5   : > { %v723_v38 = vsel %vm722_vm5, %v721_v37, %v717_v36 }
 0x4e6   : > { %v724_v39 = vpack.c.bf16 %v723_v38, %v723_v38 }
 0x4e8   : > { %961 = vmatmul.msk.bf16.vlgmr.msra.gmra.mxu1 %vm416_vm0, %v724_v39 }
 0x565   : > { %v757_v41 = vpop.f32.mrf.mxu1 }
 0x566   : > { %v758_v42 = vadd.f32 %v1099_v40, %v757_v41 }
 0x568   : > { %761 = vst.msk [vmem:[%s388_s19] sm:$0xff] %vm416_vm0, %v758_v42 }
 0x569   : > { %1323 = shalt.err (!%p1320_p13)
}
 0x56a   : > { %994 = dma.vmem_to_hbm [thread:$0]  (%p1550_p4), %s777_s15, 128, %s779_s21, %s763_s9  }
 0x56d   : > { %v759_v43 = vpop.f32.mrf.mxu1 }
 0x56e PF: > { %s790_s3 = sand.u32 1, %s1370_s24   ;;  %p1017_p0 = pnand %p916_p6, %p1558_p7 }
 0x56f   : > { %s791_s30 = scalar_lea.sflag [#allocation5], %s790_s3 }
 0x570   : > { %p1018_p2 = pneg %p1017_p0 }
 0x572   : > { %1365 = dma.done.wait (%p1018_p2), %s791_s30, 128  }
 0x573   : > { %1367 = vsyncadd (%p1018_p2), %s791_s30, 4294967168  ;;  %s26_s29 = sadd.s32 1, %s1390_s29   ;;  %s1701_s24 = smov %s1374_s25 }
 0x574   : > { %p23_p5 = scmp.ge.s32.totalorder %s26_s29, 4   ;;  %s1702_s25 = smov %s1378_s26 }
 0x575   : > { %s1703_s26 = smov %s1556_s14  ;;  %s1704_s27 = smov %s1386_s28 }
 0x576   : > { %s1705_s28 = smov %s1707_s13  ;;  %25 = sbr.rel (!%p23_p5) target bundleno = 12 (0xc), region = 118 }
 0x57b   :  { %797 = vsyncpa [#allocation4], 1 }
 0x57c   :  { %799 = vsyncpa [#allocation4 + $0x1], 1 }
 0x57d   :  { %800 = vsyncpa [#allocation7], 1 }
 0x57e   :  { %801 = vsyncpa [#allocation10], 1 }
 0x57f   :  { %802 = vsyncpa [#allocation13], 1 }
 0x580   :  { %803 = vsyncpa [#allocation5], 1 }
 0x581   :  { %805 = vsyncpa [#allocation5 + $0x1], 1 }

</bundles_post_ra>
